<compile_context>
chip_gen: v6e
topology: v6e:2x2x1
jax: 0.10.0
libtpu: 0.0.40
codegen_flags: <defaults>
</compile_context>

<pallas_src>
import functools

import jax
import jax.numpy as jnp
from jax.experimental import pallas as pl
from jax.experimental.pallas import tpu as pltpu


def _round_up(n, m):
    return ((n + m - 1) // m) * m


def _pad2d(a, rows, cols):
    return jnp.pad(a, ((0, rows - a.shape[0]), (0, cols - a.shape[1])))


def autoencoder_kernel(x_ref,
                       w1_ref, b1_ref,   # encoder layer 1: D -> H
                       w2_ref, b2_ref,   # encoder layer 2: H -> L
                       w3_ref, b3_ref,   # decoder layer 1: L -> H
                       w4_ref, b4_ref,   # decoder layer 2: H -> D
                       recon_ref, latent_ref):
    x = x_ref[...]                                   # [TB, Dp] bf16
    # Biases read once; epilogue math (bias add / ReLU / sigmoid) stays in f32.
    b1 = b1_ref[...]
    b2 = b2_ref[...]
    b3 = b3_ref[...]
    b4 = b4_ref[...]

    # ---- encoder ----
    h1 = jnp.dot(x, w1_ref[...], preferred_element_type=jnp.float32) + b1
    h1 = jnp.maximum(h1, 0.0)                        # ReLU (f32)

    z = jnp.dot(h1.astype(jnp.bfloat16), w2_ref[...],
                preferred_element_type=jnp.float32) + b2
    latent_ref[...] = z.astype(latent_ref.dtype)     # bf16 store (halves writeback)

    # ---- decoder ----
    h2 = jnp.dot(z.astype(jnp.bfloat16), w3_ref[...],
                 preferred_element_type=jnp.float32) + b3
    h2 = jnp.maximum(h2, 0.0)                        # ReLU (f32)

    y = jnp.dot(h2.astype(jnp.bfloat16), w4_ref[...],
                preferred_element_type=jnp.float32) + b4
    recon_ref[...] = jax.nn.sigmoid(y).astype(recon_ref.dtype)  # bf16 store


def pad_params(params):
    """One-time prep: zero-pad params to lane/sublane multiples, weights -> bf16.

    Hoisted out of the per-call forward path so the weights are not re-read /
    re-written through HBM on every forward call. Zero padding keeps the math
    exact (padded rows/cols contribute 0 to every dot product).
    """
    D, HID = params["w1"].shape
    LAT = params["w2"].shape[1]
    Dp, Hp, Lp = _round_up(D, 128), _round_up(HID, 128), _round_up(LAT, 128)
    return dict(
        w1=_pad2d(params["w1"], Dp, Hp).astype(jnp.bfloat16),
        w2=_pad2d(params["w2"], Hp, Lp).astype(jnp.bfloat16),
        w3=_pad2d(params["w3"], Lp, Hp).astype(jnp.bfloat16),
        w4=_pad2d(params["w4"], Hp, Dp).astype(jnp.bfloat16),
        b1=_pad2d(params["b1"], 1, Hp).astype(jnp.float32),
        b2=_pad2d(params["b2"], 1, Lp).astype(jnp.float32),
        b3=_pad2d(params["b3"], 1, Hp).astype(jnp.float32),
        b4=_pad2d(params["b4"], 1, Dp).astype(jnp.float32),
    )


@functools.partial(jax.jit, static_argnames=("latent_dim", "tb"))
def autoencoder_forward(x_nchw, padded_params, *, latent_dim, tb=512):
    """Fused autoencoder forward in a single batch-tiled Pallas kernel.

    Args:
      x_nchw: [B, C, H, W] float32 input (NCHW, PyTorch convention).
      padded_params: output of pad_params() (lane-padded, bf16 weights).
      latent_dim: true (unpadded) latent width L.
      tb: max batch tile (multiple of 8).

    Returns:
      (reconstructed [B, C, H, W] f32, latent [B, L] f32) — matches PyTorch forward.
    """
    B, C, H, W = x_nchw.shape
    D = C * H * W
    w1, w2 = padded_params["w1"], padded_params["w2"]
    w3, w4 = padded_params["w3"], padded_params["w4"]
    b1, b2 = padded_params["b1"], padded_params["b2"]
    b3, b4 = padded_params["b3"], padded_params["b4"]
    Dp, Hp = w1.shape
    Lp = w2.shape[1]

    # Batch tile: as large as possible (amortizes ~0.35us/grid-step, keeps DMA
    # streams long) while still producing >=2 grid steps whenever >=2 sublane
    # tiles of real rows exist, so v7x's two TensorCores both get a share of
    # the "parallel" batch axis.
    tb_eff = max(8, min(tb, _round_up((B + 1) // 2, 8)))
    Bp = _round_up(B, tb_eff)
    grid = (Bp // tb_eff,)

    # Flatten + pad + bf16-cast the input in one fused pass (no extra f32 copy).
    x_p = _pad2d(x_nchw.reshape(B, D), Bp, Dp).astype(jnp.bfloat16)

    batch_spec = lambda n: pl.BlockSpec((tb_eff, n), lambda i: (i, 0))
    # Weights/biases: constant index_map -> DMA'd once, VMEM-resident afterwards.
    # TODO(synk): for image-scale D (>~16K) tile w1 over its contraction axis and
    # w4 over its output columns (extra "arbitrary" grid axis + f32 acc scratch)
    # and single-buffer the weight blocks (pl.Buffered(1)) instead of keeping the
    # full w1/w4 resident — matters on v7x's 64 MiB VMEM; at D=1024 all weights
    # total <1 MiB so default buffering is negligible.
    const_spec = lambda shp: pl.BlockSpec(shp, lambda i: (0,) * len(shp))

    flops = 2 * Bp * (Dp * Hp + Hp * Lp + Lp * Hp + Hp * Dp)
    bytes_accessed = (x_p.size * 2                        # x (bf16)
                      + Bp * Dp * 2 + Bp * Lp * 2         # recon + latent (bf16)
                      + (w1.size + w2.size + w3.size + w4.size) * 2
                      + (b1.size + b2.size + b3.size + b4.size) * 4)

    recon_p, latent_p = pl.pallas_call(
        autoencoder_kernel,
        grid=grid,
        in_specs=[
            batch_spec(Dp),
            const_spec(w1.shape), const_spec(b1.shape),
            const_spec(w2.shape), const_spec(b2.shape),
            const_spec(w3.shape), const_spec(b3.shape),
            const_spec(w4.shape), const_spec(b4.shape),
        ],
        out_specs=[
            batch_spec(Dp),
            batch_spec(Lp),
        ],
        out_shape=[
            jax.ShapeDtypeStruct((Bp, Dp), jnp.bfloat16),
            jax.ShapeDtypeStruct((Bp, Lp), jnp.bfloat16),
        ],
        compiler_params=pltpu.CompilerParams(
            dimension_semantics=("parallel",),
            # Headroom for tb up to ~1024 even on v5e (16 MiB default scoped VMEM).
            vmem_limit_bytes=32 * 1024 * 1024),
        cost_estimate=pl.CostEstimate(
            flops=flops,
            transcendentals=2 * Bp * Dp,      # sigmoid = exp + reciprocal on the EUP
            bytes_accessed=bytes_accessed),
    )(x_p, w1, b1, w2, b2, w3, b3, w4, b4)

    # Upcast outside the kernel (fuses with the un-pad slice) to keep f32 outputs.
    recon = recon_p[:B, :D].astype(jnp.float32).reshape(B, C, H, W)
    latent = latent_p[:B, :latent_dim].astype(jnp.float32)
    return recon, latent


def init_params(key, in_dim, hidden_dim, latent_dim):
    """Deterministic parameter init. Weights stored as [in, out] (= PyTorch W.T)."""
    ks = jax.random.split(key, 8)

    def lin(kw, kb, fan_in, fan_out):
        bound = 1.0 / jnp.sqrt(fan_in)   # mimics torch.nn.Linear default init range
        w = jax.random.uniform(kw, (fan_in, fan_out), jnp.float32, -bound, bound)
        b = jax.random.uniform(kb, (1, fan_out), jnp.float32, -bound, bound)
        return w, b

    w1, b1 = lin(ks[0], ks[1], in_dim, hidden_dim)
    w2, b2 = lin(ks[2], ks[3], hidden_dim, latent_dim)
    w3, b3 = lin(ks[4], ks[5], latent_dim, hidden_dim)
    w4, b4 = lin(ks[6], ks[7], hidden_dim, in_dim)
    return dict(w1=w1, b1=b1, w2=w2, b2=b2, w3=w3, b3=b3, w4=w4, b4=b4)


if __name__ == "__main__":
    key = jax.random.PRNGKey(0)
    k_x, k_p = jax.random.split(key)

    # Small shapes consistent with an image autoencoder: NCHW input.
    B, C, H, W = 2, 4, 16, 16
    D = C * H * W           # 1024
    HIDDEN = 32
    LATENT = 8

    x = jax.random.uniform(k_x, (B, C, H, W), jnp.float32)   # "image" in [0, 1)
    params = init_params(k_p, D, HIDDEN, LATENT)
    padded = pad_params(params)                              # one-time prep (not per call)

    recon, latent = autoencoder_forward(x, padded, latent_dim=LATENT)
    jax.block_until_ready((recon, latent))

    # Pure-JAX f32 reference (kernel uses bf16 matmul inputs + bf16 stores ->
    # loose tolerance).
    xf = x.reshape(B, D)
    h1 = jnp.maximum(xf @ params["w1"] + params["b1"], 0.0)
    z_ref = h1 @ params["w2"] + params["b2"]
    h2 = jnp.maximum(z_ref @ params["w3"] + params["b3"], 0.0)
    recon_ref = jax.nn.sigmoid(h2 @ params["w4"] + params["b4"]).reshape(B, C, H, W)

    assert recon.shape == (B, C, H, W) and latent.shape == (B, LATENT)
    assert jnp.allclose(recon, recon_ref, atol=2e-2, rtol=2e-2), \
        float(jnp.max(jnp.abs(recon - recon_ref)))
    assert jnp.allclose(latent, z_ref, atol=2e-2, rtol=2e-2), \
        float(jnp.max(jnp.abs(latent - z_ref)))

    print("KERNEL_OK")
</pallas_src>

<mosaic_0001>
module attributes {stable_mosaic.version = 11 : i64} {
  func.func @autoencoder_kernel(%arg0: i32, %arg1: memref<8x1024xbf16, #tpu.memory_space<vmem>>, %arg2: memref<1024x128xbf16, #tpu.memory_space<vmem>>, %arg3: memref<1x128xf32, #tpu.memory_space<vmem>>, %arg4: memref<128x128xbf16, #tpu.memory_space<vmem>>, %arg5: memref<1x128xf32, #tpu.memory_space<vmem>>, %arg6: memref<128x128xbf16, #tpu.memory_space<vmem>>, %arg7: memref<1x128xf32, #tpu.memory_space<vmem>>, %arg8: memref<128x1024xbf16, #tpu.memory_space<vmem>>, %arg9: memref<1x1024xf32, #tpu.memory_space<vmem>>, %arg10: memref<8x1024xbf16, #tpu.memory_space<vmem>>, %arg11: memref<8x128xbf16, #tpu.memory_space<vmem>>) attributes {dimension_semantics = [#tpu.dimension_semantics<parallel>], iteration_bounds = array<i64: 1>, scalar_prefetch = 0 : i64, scratch_operands = 0 : i64, tpu.core_type = #tpu.core_type<tc>, window_params = [{transform_indices = @transform_0, window_bounds = array<i64: 8, 1024>}, {pipeline_mode = #tpu.pipeline_mode<synchronous>, transform_indices = @transform_1, window_bounds = array<i64: 1024, 128>}, {pipeline_mode = #tpu.pipeline_mode<synchronous>, transform_indices = @transform_2, window_bounds = array<i64: 1, 128>}, {pipeline_mode = #tpu.pipeline_mode<synchronous>, transform_indices = @transform_3, window_bounds = array<i64: 128, 128>}, {pipeline_mode = #tpu.pipeline_mode<synchronous>, transform_indices = @transform_4, window_bounds = array<i64: 1, 128>}, {pipeline_mode = #tpu.pipeline_mode<synchronous>, transform_indices = @transform_5, window_bounds = array<i64: 128, 128>}, {pipeline_mode = #tpu.pipeline_mode<synchronous>, transform_indices = @transform_6, window_bounds = array<i64: 1, 128>}, {pipeline_mode = #tpu.pipeline_mode<synchronous>, transform_indices = @transform_7, window_bounds = array<i64: 128, 1024>}, {pipeline_mode = #tpu.pipeline_mode<synchronous>, transform_indices = @transform_8, window_bounds = array<i64: 1, 1024>}, {transform_indices = @transform_9, window_bounds = array<i64: 8, 1024>}, {transform_indices = @transform_10, window_bounds = array<i64: 8, 128>}]} {
    %c0 = arith.constant 0 : index
    %c0_0 = arith.constant 0 : index
    %0 = vector.load %arg1[%c0, %c0_0] : memref<8x1024xbf16, #tpu.memory_space<vmem>>, vector<8x1024xbf16>
    %c0_1 = arith.constant 0 : index
    %c0_2 = arith.constant 0 : index
    %1 = vector.load %arg3[%c0_1, %c0_2] : memref<1x128xf32, #tpu.memory_space<vmem>>, vector<1x128xf32>
    %c0_3 = arith.constant 0 : index
    %c0_4 = arith.constant 0 : index
    %2 = vector.load %arg5[%c0_3, %c0_4] : memref<1x128xf32, #tpu.memory_space<vmem>>, vector<1x128xf32>
    %c0_5 = arith.constant 0 : index
    %c0_6 = arith.constant 0 : index
    %3 = vector.load %arg7[%c0_5, %c0_6] : memref<1x128xf32, #tpu.memory_space<vmem>>, vector<1x128xf32>
    %c0_7 = arith.constant 0 : index
    %c0_8 = arith.constant 0 : index
    %4 = vector.load %arg9[%c0_7, %c0_8] : memref<1x1024xf32, #tpu.memory_space<vmem>>, vector<1x1024xf32>
    %c0_9 = arith.constant 0 : index
    %c0_10 = arith.constant 0 : index
    %5 = vector.load %arg2[%c0_9, %c0_10] : memref<1024x128xbf16, #tpu.memory_space<vmem>>, vector<1024x128xbf16>
    %cst = arith.constant dense<0.000000e+00> : vector<8x128xf32>
    %6 = tpu.matmul %0, %5, %cst {dimension_numbers = #tpu.dot_dimension_numbers<[1], [0], [0], [1], [0, 0, 1, 1], [], []>} : vector<8x1024xbf16>, vector<1024x128xbf16>, vector<8x128xf32> -> vector<8x128xf32>
    %7 = vector.broadcast %1 : vector<1x128xf32> to vector<8x128xf32>
    %8 = arith.addf %6, %7 : vector<8x128xf32>
    %cst_11 = arith.constant 0.000000e+00 : f32
    %9 = vector.broadcast %cst_11 : f32 to vector<8x128xf32>
    %10 = arith.maximumf %8, %9 : vector<8x128xf32>
    %11 = arith.truncf %10 : vector<8x128xf32> to vector<8x128xbf16>
    %c0_12 = arith.constant 0 : index
    %c0_13 = arith.constant 0 : index
    %12 = vector.load %arg4[%c0_12, %c0_13] : memref<128x128xbf16, #tpu.memory_space<vmem>>, vector<128x128xbf16>
    %cst_14 = arith.constant dense<0.000000e+00> : vector<8x128xf32>
    %13 = tpu.matmul %11, %12, %cst_14 {dimension_numbers = #tpu.dot_dimension_numbers<[1], [0], [0], [1], [0, 0, 1, 1], [], []>} : vector<8x128xbf16>, vector<128x128xbf16>, vector<8x128xf32> -> vector<8x128xf32>
    %14 = vector.broadcast %2 : vector<1x128xf32> to vector<8x128xf32>
    %15 = arith.addf %13, %14 : vector<8x128xf32>
    %16 = arith.truncf %15 : vector<8x128xf32> to vector<8x128xbf16>
    %c0_15 = arith.constant 0 : index
    %c0_16 = arith.constant 0 : index
    %17 = vector.load %arg11[%c0_15, %c0_16] : memref<8x128xbf16, #tpu.memory_space<vmem>>, vector<8x128xbf16>
    tpu.vector_store %arg11[%c0_15, %c0_16], %16 {strides = array<i32>} : memref<8x128xbf16, #tpu.memory_space<vmem>>, vector<8x128xbf16>,
    %18 = arith.truncf %15 : vector<8x128xf32> to vector<8x128xbf16>
    %c0_17 = arith.constant 0 : index
    %c0_18 = arith.constant 0 : index
    %19 = vector.load %arg6[%c0_17, %c0_18] : memref<128x128xbf16, #tpu.memory_space<vmem>>, vector<128x128xbf16>
    %cst_19 = arith.constant dense<0.000000e+00> : vector<8x128xf32>
    %20 = tpu.matmul %18, %19, %cst_19 {dimension_numbers = #tpu.dot_dimension_numbers<[1], [0], [0], [1], [0, 0, 1, 1], [], []>} : vector<8x128xbf16>, vector<128x128xbf16>, vector<8x128xf32> -> vector<8x128xf32>
    %21 = vector.broadcast %3 : vector<1x128xf32> to vector<8x128xf32>
    %22 = arith.addf %20, %21 : vector<8x128xf32>
    %cst_20 = arith.constant 0.000000e+00 : f32
    %23 = vector.broadcast %cst_20 : f32 to vector<8x128xf32>
    %24 = arith.maximumf %22, %23 : vector<8x128xf32>
    %25 = arith.truncf %24 : vector<8x128xf32> to vector<8x128xbf16>
    %c0_21 = arith.constant 0 : index
    %c0_22 = arith.constant 0 : index
    %26 = vector.load %arg8[%c0_21, %c0_22] : memref<128x1024xbf16, #tpu.memory_space<vmem>>, vector<128x1024xbf16>
    %cst_23 = arith.constant dense<0.000000e+00> : vector<8x1024xf32>
    %27 = tpu.matmul %25, %26, %cst_23 {dimension_numbers = #tpu.dot_dimension_numbers<[1], [0], [0], [1], [0, 0, 1, 1], [], []>} : vector<8x128xbf16>, vector<128x1024xbf16>, vector<8x1024xf32> -> vector<8x1024xf32>
    %28 = vector.broadcast %4 : vector<1x1024xf32> to vector<8x1024xf32>
    %29 = arith.addf %27, %28 : vector<8x1024xf32>
    %30 = arith.negf %29 : vector<8x1024xf32>
    %31 = math.exp %30 : vector<8x1024xf32>
    %cst_24 = arith.constant 1.000000e+00 : f32
    %32 = vector.broadcast %cst_24 : f32 to vector<8x1024xf32>
    %33 = arith.addf %32, %31 : vector<8x1024xf32>
    %34 = arith.divf %32, %33 : vector<8x1024xf32>
    %35 = arith.truncf %34 : vector<8x1024xf32> to vector<8x1024xbf16>
    %c0_25 = arith.constant 0 : index
    %c0_26 = arith.constant 0 : index
    %36 = vector.load %arg10[%c0_25, %c0_26] : memref<8x1024xbf16, #tpu.memory_space<vmem>>, vector<8x1024xbf16>
    tpu.vector_store %arg10[%c0_25, %c0_26], %35 {strides = array<i32>} : memref<8x1024xbf16, #tpu.memory_space<vmem>>, vector<8x1024xbf16>,
    return
  }
  func.func @transform_0(%arg0: i32) -> (i32, i32) {
    %c0_i32 = arith.constant 0 : i32
    %c0_i32_0 = arith.constant 0 : i32
    return %arg0, %c0_i32 : i32, i32
  }
  func.func @transform_1(%arg0: i32) -> (i32, i32) {
    %c0_i32 = arith.constant 0 : i32
    %c0_i32_0 = arith.constant 0 : i32
    %c0_i32_1 = arith.constant 0 : i32
    return %c0_i32, %c0_i32_0 : i32, i32
  }
  func.func @transform_2(%arg0: i32) -> (i32, i32) {
    %c0_i32 = arith.constant 0 : i32
    %c0_i32_0 = arith.constant 0 : i32
    %c0_i32_1 = arith.constant 0 : i32
    return %c0_i32, %c0_i32_0 : i32, i32
  }
  func.func @transform_3(%arg0: i32) -> (i32, i32) {
    %c0_i32 = arith.constant 0 : i32
    %c0_i32_0 = arith.constant 0 : i32
    %c0_i32_1 = arith.constant 0 : i32
    return %c0_i32, %c0_i32_0 : i32, i32
  }
  func.func @transform_4(%arg0: i32) -> (i32, i32) {
    %c0_i32 = arith.constant 0 : i32
    %c0_i32_0 = arith.constant 0 : i32
    %c0_i32_1 = arith.constant 0 : i32
    return %c0_i32, %c0_i32_0 : i32, i32
  }
  func.func @transform_5(%arg0: i32) -> (i32, i32) {
    %c0_i32 = arith.constant 0 : i32
    %c0_i32_0 = arith.constant 0 : i32
    %c0_i32_1 = arith.constant 0 : i32
    return %c0_i32, %c0_i32_0 : i32, i32
  }
  func.func @transform_6(%arg0: i32) -> (i32, i32) {
    %c0_i32 = arith.constant 0 : i32
    %c0_i32_0 = arith.constant 0 : i32
    %c0_i32_1 = arith.constant 0 : i32
    return %c0_i32, %c0_i32_0 : i32, i32
  }
  func.func @transform_7(%arg0: i32) -> (i32, i32) {
    %c0_i32 = arith.constant 0 : i32
    %c0_i32_0 = arith.constant 0 : i32
    %c0_i32_1 = arith.constant 0 : i32
    return %c0_i32, %c0_i32_0 : i32, i32
  }
  func.func @transform_8(%arg0: i32) -> (i32, i32) {
    %c0_i32 = arith.constant 0 : i32
    %c0_i32_0 = arith.constant 0 : i32
    %c0_i32_1 = arith.constant 0 : i32
    return %c0_i32, %c0_i32_0 : i32, i32
  }
  func.func @transform_9(%arg0: i32) -> (i32, i32) {
    %c0_i32 = arith.constant 0 : i32
    %c0_i32_0 = arith.constant 0 : i32
    return %arg0, %c0_i32 : i32, i32
  }
  func.func @transform_10(%arg0: i32) -> (i32, i32) {
    %c0_i32 = arith.constant 0 : i32
    %c0_i32_0 = arith.constant 0 : i32
    return %arg0, %c0_i32 : i32, i32
  }
}

</mosaic_0001>

<bundles_post_ra>
// kernel: autoencoder_forward.1
= control target key start
LH: loop header
LB: loop body
LE: loop exit
PB: predicated region body
PF: predicated region fallthrough
CT: control target
= control target key end

     0   :  { %16 = vsyncpa [#allocation3], 0  ;;  %s2339_s0 = inlined_call_operand.vmem [shape: bf16[8,1024], index: 0, kind: input, shape index: {}]   ;;  %s2340_s1 = inlined_call_operand.hbm [shape: bf16[1024,128], index: 1, kind: input, shape index: {}]   ;;  %s2341_s2 = inlined_call_operand.vmem [shape: f32[1,128], index: 2, kind: input, shape index: {}]   ;;  %s2342_s3 = inlined_call_operand.vmem [shape: bf16[128,128], index: 3, kind: input, shape index: {}]   ;;  %s2343_s4 = inlined_call_operand.vmem [shape: f32[1,128], index: 4, kind: input, shape index: {}]   ;;  %s2344_s5 = inlined_call_operand.vmem [shape: bf16[128,128], index: 5, kind: input, shape index: {}]   ;;  %s2345_s6 = inlined_call_operand.vmem [shape: f32[1,128], index: 6, kind: input, shape index: {}]   ;;  %s2346_s7 = inlined_call_operand.hbm [shape: bf16[128,1024], index: 7, kind: input, shape index: {}]   ;;  %s2347_s8 = inlined_call_operand.vmem [shape: f32[1,1024], index: 8, kind: input, shape index: {}]   ;;  %s2348_s9 = inlined_call_operand.vmem [shape: bf16[8,1024], index: 9, kind: output, shape index: {0}]   ;;  %s2349_s10 = inlined_call_operand.vmem [shape: bf16[8,128], index: 10, kind: output, shape index: {1}]  }
   0x1   :  { %17 = vsyncpa [#allocation5], 0  ;;  %s2176_s13 = smov [#allocation2]  }
   0x2   :  { %s25_s14 = sshll.u32 %s2176_s13, 4  ;;  %s26_s14 = int_to_ptr.vmem [resolvable:$true] %s25_s14 }
   0x3   :  { %s2140_s15 = scalar_lea.vmem %s26_s14, 8192  ;;  %p2145_p1 = scmp.lt.s32.totalorder %s26_s14, %s26_s14 }
   0x4   :  { %p2141_p0 = scmp.ne.s32.totalorder %s26_s14, %s2140_s15  ;;  %p2146_p2 = scmp.lt.s32.totalorder %s2140_s15, %s2140_s15 }
   0x6   :  { %p2147_p3 = por %p2146_p2, %p2145_p1 }
   0x8   :  { %p2148_p4 = pnand %p2147_p3, %p2141_p0 }
   0xa   :  { %2151 = shalt.err (!%p2148_p4)
}
   0xb   :  { %s2177_s16 = smov 64   ;;  %s2178_s17 = smov 4  }
   0xc   :  { %31 = dma.hbm_to_vmem [thread:$0]  %s2340_s1, 8192, %s26_s14, [#allocation3], %s2177_s16, %s2177_s16, %s2178_s17  }
   0xd   :  { %s2179_s20 = smov [#allocation4]  }
   0xe   :  { %s47_s21 = sshll.u32 %s2179_s20, 4  ;;  %s48_s21 = int_to_ptr.vmem [resolvable:$true] %s47_s21 }
   0xf   :  { %s2160_s22 = scalar_lea.vmem %s48_s21, 8192  ;;  %p2165_p6 = scmp.lt.s32.totalorder %s48_s21, %s48_s21 }
  0x10   :  { %p2161_p5 = scmp.ne.s32.totalorder %s48_s21, %s2160_s22  ;;  %p2166_p7 = scmp.lt.s32.totalorder %s2160_s22, %s2160_s22 }
  0x12   :  { %p2167_p8 = por %p2166_p7, %p2165_p6 }
  0x14   :  { %p2168_p9 = pnand %p2167_p8, %p2161_p5 }
  0x16   :  { %2171 = shalt.err (!%p2168_p9)
}
  0x17   :  { %s2180_s23 = smov 512   ;;  %s2181_s24 = smov 32  }
  0x18   :  { %53 = dma.hbm_to_vmem [thread:$0]  %s2346_s7, 8192, %s48_s21, [#allocation5], %s2180_s23, %s2180_s23, %s2181_s24  }
  0x19   :  { %2172 = dma.done.wait [#allocation3], 8192  }
  0x1a   :  { %2173 = vsyncadd [#allocation3], 4294959104 }
  0x1b   :  { %2174 = dma.done.wait [#allocation5], 8192  }
  0x1c   :  { %2175 = vsyncadd [#allocation5], 4294959104  ;;  %v2012_v0 = vld [vmem:[#allocation2 + $0x78] sm:$0xff]   ;;  %v2016_v4 = vld [vmem:[#allocation2 + $0x70] sm:$0xff]   ;;  %vm2183_vm0 = vmmov 0  }
  0x1d   :  { %v2013_v1 = vld [vmem:[#allocation2 + $0xf8] sm:$0xff]   ;;  %1857 = vmatprep.subr.bf16.mxu0 %v2012_v0  ;;  %v2017_v5 = vld [vmem:[#allocation2 + $0xf0] sm:$0xff]   ;;  %v2020_v8 = vld [vmem:[#allocation2 + $0x68] sm:$0xff]  }
  0x1e   :  { %v2014_v2 = vld [vmem:[#allocation2 + $0x38] sm:$0xff]   ;;  %1879 = vmatprep.subr.bf16.mxu1 %v2013_v1  ;;  %v2018_v6 = vld [vmem:[#allocation2 + $0x30] sm:$0xff]   ;;  %v2021_v9 = vld [vmem:[#allocation2 + $0xe8] sm:$0xff]  }
  0x1f   :  { %v2015_v3 = vld [vmem:[#allocation2 + $0xb8] sm:$0xff]   ;;  %1858 = vmatpush3.bf16.msra.mxu0 %v2014_v2  ;;  %v2019_v7 = vld [vmem:[#allocation2 + $0xb0] sm:$0xff]   ;;  %v2022_v10 = vld [vmem:[#allocation2 + $0x28] sm:$0xff]  }
  0x20   :  { %1880 = vmatpush3.bf16.msra.mxu1 %v2015_v3  ;;  %1859 = vmatprep.subr.bf16.mxu0 %v2016_v4  ;;  %v2023_v11 = vld [vmem:[#allocation2 + $0xa8] sm:$0xff]   ;;  %v2024_v12 = vld [vmem:[#allocation2 + $0x60] sm:$0xff]   ;;  %v2028_v16 = vld [vmem:[#allocation2 + $0x58] sm:$0xff]  }
  0x21   :  { %1881 = vmatprep.subr.bf16.mxu1 %v2017_v5  ;;  %v2025_v13 = vld [vmem:[#allocation2 + $0xe0] sm:$0xff]   ;;  %v2029_v17 = vld [vmem:[#allocation2 + $0xd8] sm:$0xff]   ;;  %v2032_v20 = vld [vmem:[#allocation2 + $0x50] sm:$0xff]  }
  0x22   :  { %v2026_v14 = vld [vmem:[#allocation2 + $0x20] sm:$0xff]   ;;  %v2030_v18 = vld [vmem:[#allocation2 + $0x18] sm:$0xff]   ;;  %v2033_v21 = vld [vmem:[#allocation2 + $0xd0] sm:$0xff]  }
  0x23   :  { %1860 = vmatpush3.bf16.msra.mxu0 %v2018_v6  ;;  %v2027_v15 = vld [vmem:[#allocation2 + $0xa0] sm:$0xff]   ;;  %v2031_v19 = vld [vmem:[#allocation2 + $0x98] sm:$0xff]   ;;  %v2034_v22 = vld [vmem:[#allocation2 + $0x10] sm:$0xff]  }
  0x24   :  { %1882 = vmatpush3.bf16.msra.mxu1 %v2019_v7  ;;  %1861 = vmatprep.subr.bf16.mxu0 %v2020_v8  ;;  %v2035_v23 = vld [vmem:[#allocation2 + $0x90] sm:$0xff]   ;;  %v2036_v24 = vld [vmem:[#allocation2 + $0x48] sm:$0xff]   ;;  %v2040_v28 = vld [vmem:[#allocation2 + $0x40] sm:$0xff]  }
  0x25   :  { %1883 = vmatprep.subr.bf16.mxu1 %v2021_v9  ;;  %v2037_v25 = vld [vmem:[#allocation2 + $0xc8] sm:$0xff]   ;;  %v2041_v29 = vld [vmem:[#allocation2 + $0xc0] sm:$0xff]   ;;  %v2048_v38 = vld [vmem:[#allocation2 + $0x178] sm:$0xff]  }
  0x26   :  { %v2038_v26 = vld [vmem:[#allocation2 + $0x8] sm:$0xff]   ;;  %v2042_v30 = vld [vmem:[#allocation2] sm:$0xff]   ;;  %v2049_v39 = vld [vmem:[#allocation2 + $0x1f8] sm:$0xff]  }
  0x27   :  { %1862 = vmatpush3.bf16.msra.mxu0 %v2022_v10  ;;  %v2039_v27 = vld [vmem:[#allocation2 + $0x88] sm:$0xff]   ;;  %v2043_v31 = vld [vmem:[#allocation2 + $0x80] sm:$0xff]   ;;  %v2050_v40 = vld [vmem:[#allocation2 + $0x138] sm:$0xff]  }
  0x28   :  { %1884 = vmatpush3.bf16.msra.mxu1 %v2023_v11  ;;  %1863 = vmatprep.subr.bf16.mxu0 %v2024_v12  ;;  %v63_v32 = vld [vmem:[%s2339_s0] sm:$0xff]  ;;  %v64_v33 = vld [vmem:[%s2339_s0 + $0x8] sm:$0xff]  ;;  %v2051_v41 = vld [vmem:[#allocation2 + $0x1b8] sm:$0xff]  }
  0x29   :  { %1885 = vmatprep.subr.bf16.mxu1 %v2025_v13  ;;  %v1687_v34 = vcombine.low %v63_v32, %v63_v32  ;;  %v1688_v35 = vcombine.high %v63_v32, %v63_v32  ;;  %v1689_v36 = vcombine.low %v64_v33, %v64_v33  ;;  %v1690_v37 = vcombine.high %v64_v33, %v64_v33  ;;  %v2052_v42 = vld [vmem:[#allocation2 + $0x170] sm:$0xff]   ;;  %v2056_v46 = vld [vmem:[#allocation2 + $0x168] sm:$0xff]   ;;  %v2060_v50 = vld [vmem:[#allocation2 + $0x160] sm:$0xff]  }
  0x2a   :  { %v2053_v43 = vld [vmem:[#allocation2 + $0x1f0] sm:$0xff]   ;;  %v2057_v47 = vld [vmem:[#allocation2 + $0x1e8] sm:$0xff]   ;;  %v2061_v51 = vld [vmem:[#allocation2 + $0x1e0] sm:$0xff]   ;;  %v2182_v13 = vmov 0.0  }
  0x2b   :  { %1864 = vmatpush3.bf16.msra.mxu0 %v2026_v14  ;;  %649 = vmatprep.mubr.bf16.mxu0 %v1688_v35  ;;  %v2054_v44 = vld [vmem:[#allocation2 + $0x130] sm:$0xff]   ;;  %v2058_v48 = vld [vmem:[#allocation2 + $0x128] sm:$0xff]   ;;  %v2062_v52 = vld [vmem:[#allocation2 + $0x120] sm:$0xff]  }
  0x2c   :  { %1886 = vmatpush3.bf16.msra.mxu1 %v2027_v15  ;;  %1865 = vmatprep.subr.bf16.mxu0 %v2028_v16  ;;  %v2055_v45 = vld [vmem:[#allocation2 + $0x1b0] sm:$0xff]   ;;  %v2059_v49 = vld [vmem:[#allocation2 + $0x1a8] sm:$0xff]   ;;  %v2063_v53 = vld [vmem:[#allocation2 + $0x1a0] sm:$0xff]  }
  0x2d   :  { %1887 = vmatprep.subr.bf16.mxu1 %v2029_v17  ;;  %689 = vmatprep.mubr.bf16.mxu1 %v1690_v37  ;;  %v2064_v54 = vld [vmem:[#allocation2 + $0x158] sm:$0xff]   ;;  %v2068_v58 = vld [vmem:[#allocation2 + $0x150] sm:$0xff]   ;;  %v2072_v62 = vld [vmem:[#allocation2 + $0x148] sm:$0xff]  }
  0x2e   :  { %v2065_v55 = vld [vmem:[#allocation2 + $0x1d8] sm:$0xff]   ;;  %v2069_v59 = vld [vmem:[#allocation2 + $0x1d0] sm:$0xff]   ;;  %v2073_v63 = vld [vmem:[#allocation2 + $0x1c8] sm:$0xff]  }
  0x2f   :  { %1866 = vmatpush3.bf16.msra.mxu0 %v2030_v18  ;;  %v2066_v56 = vld [vmem:[#allocation2 + $0x118] sm:$0xff]   ;;  %v2070_v60 = vld [vmem:[#allocation2 + $0x110] sm:$0xff]   ;;  %v2074_v0 = vld [vmem:[#allocation2 + $0x108] sm:$0xff]  }
  0x30   :  { %1888 = vmatpush3.bf16.msra.mxu1 %v2031_v19  ;;  %1867 = vmatprep.subr.bf16.mxu0 %v2032_v20  ;;  %v2067_v57 = vld [vmem:[#allocation2 + $0x198] sm:$0xff]   ;;  %v2071_v61 = vld [vmem:[#allocation2 + $0x190] sm:$0xff]   ;;  %v2075_v1 = vld [vmem:[#allocation2 + $0x188] sm:$0xff]  }
  0x31   :  { %1889 = vmatprep.subr.bf16.mxu1 %v2033_v21  ;;  %v2076_v2 = vld [vmem:[#allocation2 + $0x140] sm:$0xff]   ;;  %v65_v6 = vld [vmem:[%s2339_s0 + $0x10] sm:$0xff]  ;;  %v66_v9 = vld [vmem:[%s2339_s0 + $0x18] sm:$0xff] }
  0x32   :  { %v2077_v3 = vld [vmem:[#allocation2 + $0x1c0] sm:$0xff]   ;;  %v1691_v7 = vcombine.low %v65_v6, %v65_v6  ;;  %v1692_v8 = vcombine.high %v65_v6, %v65_v6  ;;  %v1693_v10 = vcombine.low %v66_v9, %v66_v9  ;;  %v1694_v11 = vcombine.high %v66_v9, %v66_v9  ;;  %v2084_v12 = vld [vmem:[%s2342_s3 + $0x38] sm:$0xff]   ;;  %v2085_v14 = vld [vmem:[%s2342_s3 + $0x30] sm:$0xff]  }
  0x33   :  { %1868 = vmatpush3.bf16.msra.mxu0 %v2034_v22  ;;  %v2078_v4 = vld [vmem:[#allocation2 + $0x100] sm:$0xff]   ;;  %v2086_v15 = vld [vmem:[%s2342_s3 + $0x28] sm:$0xff]   ;;  %v2088_v17 = vld [vmem:[%s2342_s3 + $0x18] sm:$0xff]  }
  0x34   :  { %1890 = vmatpush3.bf16.msra.mxu1 %v2035_v23  ;;  %1869 = vmatprep.subr.bf16.mxu0 %v2036_v24  ;;  %v2079_v5 = vld [vmem:[#allocation2 + $0x180] sm:$0xff]   ;;  %v2089_v18 = vld [vmem:[%s2342_s3 + $0x10] sm:$0xff]   ;;  %v2090_v19 = vld [vmem:[%s2342_s3 + $0x8] sm:$0xff]  }
  0x35   :  { %1891 = vmatprep.subr.bf16.mxu1 %v2037_v25  ;;  %v2087_v16 = vld [vmem:[%s2342_s3 + $0x20] sm:$0xff]   ;;  %v2092_v21 = vld [vmem:[%s2344_s5 + $0x38] sm:$0xff]   ;;  %v2093_v22 = vld [vmem:[%s2344_s5 + $0x30] sm:$0xff]  }
  0x36   :  { %v2091_v20 = vld [vmem:[%s2342_s3] sm:$0xff]   ;;  %v2094_v23 = vld [vmem:[%s2344_s5 + $0x28] sm:$0xff]   ;;  %v2096_v25 = vld [vmem:[%s2344_s5 + $0x18] sm:$0xff]  }
  0x37   :  { %1870 = vmatpush3.bf16.msra.mxu0 %v2038_v26  ;;  %v2095_v24 = vld [vmem:[%s2344_s5 + $0x20] sm:$0xff]   ;;  %v2097_v26 = vld [vmem:[%s2344_s5 + $0x10] sm:$0xff]  }
  0x38   :  { %1892 = vmatpush3.bf16.msra.mxu1 %v2039_v27  ;;  %1871 = vmatprep.subr.bf16.mxu0 %v2040_v28  ;;  %v2098_v27 = vld [vmem:[%s2344_s5 + $0x8] sm:$0xff]   ;;  %v1686_v37 = vld [vmem:[%s2341_s2] ss:$0 sm:$0xff] }
  0x39   :  { %1893 = vmatprep.subr.bf16.mxu1 %v2041_v29  ;;  %v1039_v9 = vld [vmem:[#allocation4 + $0x120] sm:$0xff] }
  0x3b   :  { %1872 = vmatpush3.bf16.msra.mxu0 %v2042_v30 }
  0x3c   :  { %1894 = vmatpush3.bf16.msra.mxu1 %v2043_v31  ;;  %1901 = vmatprep.subr.bf16.mxu0 %v2048_v38 }
  0x3d   :  { %1923 = vmatprep.subr.bf16.mxu1 %v2049_v39 }
  0x3e   :  { %650 = vmatmul.mubr.bf16.vlgmr.msra.gmra.mxu0 %v1687_v34 }
  0x3f   :  { %690 = vmatmul.mubr.bf16.vlgmr.msra.gmra.mxu1 %v1689_v36  ;;  %1902 = vmatpush3.bf16.msra.mxu0 %v2050_v40 }
  0x40   :  { %1924 = vmatpush3.bf16.msra.mxu1 %v2051_v41  ;;  %1903 = vmatprep.subr.bf16.mxu0 %v2052_v42 }
  0x41   :  { %1925 = vmatprep.subr.bf16.mxu1 %v2053_v43  ;;  %729 = vmatprep.mubr.bf16.mxu0 %v1692_v8  ;;  %v1035_v8 = vld [vmem:[#allocation4 + $0x100] sm:$0xff] }
  0x42   :  { %769 = vmatprep.mubr.bf16.mxu1 %v1694_v11  ;;  %v1809_v11 = vcombine.low %v1035_v8, %v1039_v9 }
  0x43   :  { %1904 = vmatpush3.bf16.msra.mxu0 %v2054_v44 }
  0x44   :  { %1926 = vmatpush3.bf16.msra.mxu1 %v2055_v45  ;;  %1905 = vmatprep.subr.bf16.mxu0 %v2056_v46 }
  0x45   :  { %1927 = vmatprep.subr.bf16.mxu1 %v2057_v47 }
  0x47   :  { %1906 = vmatpush3.bf16.msra.mxu0 %v2058_v48 }
  0x48   :  { %1928 = vmatpush3.bf16.msra.mxu1 %v2059_v49  ;;  %1907 = vmatprep.subr.bf16.mxu0 %v2060_v50 }
  0x49   :  { %1929 = vmatprep.subr.bf16.mxu1 %v2061_v51 }
  0x4b   :  { %1908 = vmatpush3.bf16.msra.mxu0 %v2062_v52 }
  0x4c   :  { %1930 = vmatpush3.bf16.msra.mxu1 %v2063_v53  ;;  %1909 = vmatprep.subr.bf16.mxu0 %v2064_v54 }
  0x4d   :  { %1931 = vmatprep.subr.bf16.mxu1 %v2065_v55  ;;  %v2099_v55 = vld [vmem:[%s2344_s5] sm:$0xff]  }
  0x4f   :  { %1910 = vmatpush3.bf16.msra.mxu0 %v2066_v56  ;;  %v1059_v56 = vld [vmem:[#allocation4 + $0x1c0] sm:$0xff] }
  0x50   :  { %1932 = vmatpush3.bf16.msra.mxu1 %v2067_v57  ;;  %1911 = vmatprep.subr.bf16.mxu0 %v2068_v58  ;;  %v1063_v57 = vld [vmem:[#allocation4 + $0x1e0] sm:$0xff]  ;;  %v1060_v58 = vld [vmem:[#allocation4 + $0x1c8] sm:$0xff] }
  0x51   :  { %1933 = vmatprep.subr.bf16.mxu1 %v2069_v59  ;;  %v1833_v59 = vcombine.low %v1059_v56, %v1063_v57 }
  0x53   :  { %1912 = vmatpush3.bf16.msra.mxu0 %v2070_v60  ;;  %v1834_v60 = vcombine.high %v1059_v56, %v1063_v57  ;;  %v1007_v56 = vld [vmem:[#allocation4 + $0x20] sm:$0xff]  ;;  %v1004_v57 = vld [vmem:[#allocation4 + $0x8] sm:$0xff] }
  0x54   :  { %1934 = vmatpush3.bf16.msra.mxu1 %v2071_v61  ;;  %1913 = vmatprep.subr.bf16.mxu0 %v2072_v62  ;;  %v1064_v61 = vld [vmem:[#allocation4 + $0x1e8] sm:$0xff]  ;;  %v1051_v62 = vld [vmem:[#allocation4 + $0x180] sm:$0xff] }
  0x55   :  { %1935 = vmatprep.subr.bf16.mxu1 %v2073_v63  ;;  %v1055_v63 = vld [vmem:[#allocation4 + $0x1a0] sm:$0xff] }
  0x57   :  { %1914 = vmatpush3.bf16.msra.mxu0 %v2074_v0  ;;  %v1835_v0 = vcombine.low %v1060_v58, %v1064_v61 }
  0x58   :  { %1936 = vmatpush3.bf16.msra.mxu1 %v2075_v1  ;;  %1915 = vmatprep.subr.bf16.mxu0 %v2076_v2  ;;  %v1836_v1 = vcombine.high %v1060_v58, %v1064_v61  ;;  %v1826_v2 = vcombine.high %v1051_v62, %v1055_v63 }
  0x59   :  { %1937 = vmatprep.subr.bf16.mxu1 %v2077_v3  ;;  %v1825_v3 = vcombine.low %v1051_v62, %v1055_v63  ;;  %v1061_v63 = vld [vmem:[#allocation4 + $0x1d0] sm:$0xff] }
  0x5b   :  { %1916 = vmatpush3.bf16.msra.mxu0 %v2078_v4  ;;  %v1043_v4 = vld [vmem:[#allocation4 + $0x140] sm:$0xff] }
  0x5c   :  { %1938 = vmatpush3.bf16.msra.mxu1 %v2079_v5  ;;  %1963 = vmatprep.subr.bf16.mxu0 %v2182_v13  ;;  %v1047_v5 = vld [vmem:[#allocation4 + $0x160] sm:$0xff] }
  0x5d   :  { %1983 = vmatprep.subr.bf16.mxu1 %v2182_v13  ;;  %v1818_v6 = vcombine.high %v1043_v4, %v1047_v5 }
  0x5e   :  { %730 = vmatmul.mubr.bf16.vlgmr.msra.gmra.mxu0 %v1691_v7  ;;  %v1817_v7 = vcombine.low %v1043_v4, %v1047_v5 }
  0x5f   :  { %770 = vmatmul.mubr.bf16.vlgmr.msra.gmra.mxu1 %v1693_v10  ;;  %1964 = vmatpush3.bf16.msra.mxu0 %v2084_v12  ;;  %v1810_v10 = vcombine.high %v1035_v8, %v1039_v9  ;;  %v1027_v12 = vld [vmem:[#allocation4 + $0xc0] sm:$0xff] }
  0x60   :  { %1965 = vmatprep.subr.bf16.mxu0 %v2182_v13  ;;  %1979 = vmatprep.mubr.msk.bf16.mxu0 %vm2183_vm0, %v2182_v13  ;;  %v1768_v8 = vld [vmem:[%s2345_s6] ss:$0 sm:$0xff] }
  0x61   :  { %1999 = vmatprep.mubr.msk.bf16.mxu1 %vm2183_vm0, %v2182_v13  ;;  %1984 = vmatpush3.bf16.msra.mxu1 %v2092_v21  ;;  %v1015_v21 = vld [vmem:[#allocation4 + $0x60] sm:$0xff] }
  0x62   :  { %1985 = vmatprep.subr.bf16.mxu1 %v2182_v13 }
  0x63   :  { %1966 = vmatpush3.bf16.msra.mxu0 %v2085_v14 }
  0x64   :  { %1967 = vmatprep.subr.bf16.mxu0 %v2182_v13 }
  0x65   :  { %1986 = vmatpush3.bf16.msra.mxu1 %v2093_v22 }
  0x66   :  { %1987 = vmatprep.subr.bf16.mxu1 %v2182_v13 }
  0x67   :  { %1968 = vmatpush3.bf16.msra.mxu0 %v2086_v15 }
  0x68   :  { %1969 = vmatprep.subr.bf16.mxu0 %v2182_v13 }
  0x69   :  { %1988 = vmatpush3.bf16.msra.mxu1 %v2094_v23 }
  0x6a   :  { %1989 = vmatprep.subr.bf16.mxu1 %v2182_v13 }
  0x6b   :  { %1970 = vmatpush3.bf16.msra.mxu0 %v2087_v16  ;;  %v1019_v16 = vld [vmem:[#allocation4 + $0x80] sm:$0xff] }
  0x6c   :  { %1971 = vmatprep.subr.bf16.mxu0 %v2182_v13 }
  0x6d   :  { %1990 = vmatpush3.bf16.msra.mxu1 %v2095_v24  ;;  %v1759_v24 = vld [vmem:[%s2343_s4] ss:$0 sm:$0xff] }
  0x6e   :  { %1991 = vmatprep.subr.bf16.mxu1 %v2182_v13 }
  0x6f   :  { %1972 = vmatpush3.bf16.msra.mxu0 %v2088_v17  ;;  %v1023_v17 = vld [vmem:[#allocation4 + $0xa0] sm:$0xff] }
  0x70   :  { %1973 = vmatprep.subr.bf16.mxu0 %v2182_v13 }
  0x71   :  { %1992 = vmatpush3.bf16.msra.mxu1 %v2096_v25 }
  0x72   :  { %1993 = vmatprep.subr.bf16.mxu1 %v2182_v13 }
  0x73   :  { %1974 = vmatpush3.bf16.msra.mxu0 %v2089_v18  ;;  %v1794_v18 = vcombine.high %v1019_v16, %v1023_v17 }
  0x74   :  { %1975 = vmatprep.subr.bf16.mxu0 %v2182_v13 }
  0x75   :  { %1994 = vmatpush3.bf16.msra.mxu1 %v2097_v26  ;;  %v1052_v26 = vld [vmem:[#allocation4 + $0x188] sm:$0xff] }
  0x76   :  { %1995 = vmatprep.subr.bf16.mxu1 %v2182_v13 }
  0x77   :  { %1976 = vmatpush3.bf16.msra.mxu0 %v2090_v19  ;;  %v1793_v19 = vcombine.low %v1019_v16, %v1023_v17 }
  0x78   :  { %1977 = vmatprep.subr.bf16.mxu0 %v2182_v13 }
  0x79   :  { %1996 = vmatpush3.bf16.msra.mxu1 %v2098_v27  ;;  %v1056_v27 = vld [vmem:[#allocation4 + $0x1a8] sm:$0xff] }
  0x7a   :  { %1997 = vmatprep.subr.bf16.mxu1 %v2182_v13  ;;  %v1031_v13 = vld [vmem:[#allocation4 + $0xe0] sm:$0xff] }
  0x7b   :  { %1978 = vmatpush3.bf16.msra.mxu0 %v2091_v20  ;;  %v1802_v14 = vcombine.high %v1027_v12, %v1031_v13  ;;  %v1801_v15 = vcombine.low %v1027_v12, %v1031_v13  ;;  %v1011_v20 = vld [vmem:[#allocation4 + $0x40] sm:$0xff]  ;;  %v1057_v13 = vld [vmem:[#allocation4 + $0x1b0] sm:$0xff] }
  0x7c   :  { %1428 = vmatprep.subr.bf16.mxu0 %v1834_v60  ;;  %v1786_v22 = vcombine.high %v1011_v20, %v1015_v21  ;;  %v1785_v23 = vcombine.low %v1011_v20, %v1015_v21  ;;  %v1045_v21 = vld [vmem:[#allocation4 + $0x150] sm:$0xff] }
  0x7d   :  { %1998 = vmatpush3.bf16.msra.mxu1 %v2099_v55  ;;  %v1003_v55 = vld [vmem:[#allocation4] sm:$0xff] }
  0x7e   :  { %1469 = vmatprep.subr.bf16.mxu1 %v1836_v1  ;;  %v1778_v58 = vcombine.high %v1003_v55, %v1007_v56  ;;  %v1777_v60 = vcombine.low %v1003_v55, %v1007_v56  ;;  %v1062_v1 = vld [vmem:[#allocation4 + $0x1d8] sm:$0xff]  ;;  %v1017_v55 = vld [vmem:[#allocation4 + $0x70] sm:$0xff] }
  0x7f   :  { %v1014_v56 = vld [vmem:[#allocation4 + $0x58] sm:$0xff] }
  0xfe   :  { %v1873_v28 = vpop.f32.mrf.mxu0 }
  0xff   :  { %v1895_v29 = vpop.f32.mrf.mxu1 }
 0x100   :  { %v1874_v30 = vpop.f32.mrf.mxu0 }
 0x101   :  { %v1896_v31 = vpop.f32.mrf.mxu1  ;;  %v1875_v36 = vadd.f32 %v1874_v30, %v1873_v28 }
 0x102   :  { %v1876_v32 = vpop.f32.mrf.mxu0  ;;  %v1897_v39 = vadd.f32 %v1896_v31, %v1895_v29  ;;  %v1828_v31 = vcombine.high %v1052_v26, %v1056_v27 }
 0x103   :  { %v1898_v33 = vpop.f32.mrf.mxu1  ;;  %v652_v38 = vadd.f32 %v1875_v36, %v1686_v37  ;;  %v1827_v36 = vcombine.low %v1052_v26, %v1056_v27 }
 0x104   :  { %v1877_v34 = vpop.f32.mrf.mxu0  ;;  %v1044_v33 = vld [vmem:[#allocation4 + $0x148] sm:$0xff] }
 0x105   :  { %v1899_v35 = vpop.f32.mrf.mxu1  ;;  %v692_v44 = vadd.f32 %v1897_v39, %v652_v38  ;;  %v1048_v34 = vld [vmem:[#allocation4 + $0x168] sm:$0xff] }
 0x106   :  { %v1820_v37 = vcombine.high %v1044_v33, %v1048_v34  ;;  %v1036_v38 = vld [vmem:[#allocation4 + $0x108] sm:$0xff] }
 0x107   :  { %v1040_v39 = vld [vmem:[#allocation4 + $0x128] sm:$0xff] }
 0x11e   :  { %v1917_v40 = vpop.f32.mrf.mxu0 }
 0x11f   :  { %v1939_v41 = vpop.f32.mrf.mxu1 }
 0x120   :  { %v1918_v42 = vpop.f32.mrf.mxu0 }
 0x121   :  { %v1940_v43 = vpop.f32.mrf.mxu1  ;;  %v1919_v45 = vadd.f32 %v1918_v42, %v1917_v40  ;;  %v1819_v40 = vcombine.low %v1044_v33, %v1048_v34  ;;  %v1028_v42 = vld [vmem:[#allocation4 + $0xc8] sm:$0xff]  ;;  %v1042_v33 = vld [vmem:[#allocation4 + $0x138] sm:$0xff] }
 0x122   :  { %v1920_v46 = vpop.f32.mrf.mxu0  ;;  %v1941_v49 = vadd.f32 %v1940_v43, %v1939_v41  ;;  %v1812_v41 = vcombine.high %v1036_v38, %v1040_v39  ;;  %v1032_v43 = vld [vmem:[#allocation4 + $0xe8] sm:$0xff] }
 0x123   :  { %v1942_v47 = vpop.f32.mrf.mxu1  ;;  %v732_v48 = vadd.f32 %v1919_v45, %v692_v44  ;;  %v1811_v44 = vcombine.low %v1036_v38, %v1040_v39  ;;  %v1804_v45 = vcombine.high %v1028_v42, %v1032_v43  ;;  %v1020_v46 = vld [vmem:[#allocation4 + $0x88] sm:$0xff]  ;;  %v1029_v38 = vld [vmem:[#allocation4 + $0xd0] sm:$0xff] }
 0x124   :  { %v1921_v50 = vpop.f32.mrf.mxu0  ;;  %v1024_v47 = vld [vmem:[#allocation4 + $0xa8] sm:$0xff]  ;;  %v1033_v39 = vld [vmem:[#allocation4 + $0xf0] sm:$0xff] }
 0x125   :  { %v1943_v51 = vpop.f32.mrf.mxu1  ;;  %v772_v52 = vadd.f32 %v1941_v49, %v732_v48  ;;  %v1803_v48 = vcombine.low %v1028_v42, %v1032_v43  ;;  %v1796_v49 = vcombine.high %v1020_v46, %v1024_v47  ;;  %v1012_v50 = vld [vmem:[#allocation4 + $0x48] sm:$0xff] }
 0x126   :  { %v1016_v51 = vld [vmem:[#allocation4 + $0x68] sm:$0xff] }
 0x127   :  { %v777_v53 = vmax.f32 %v772_v52, 0.0  ;;  %v1795_v52 = vcombine.low %v1020_v46, %v1024_v47  ;;  %v1021_v46 = vld [vmem:[#allocation4 + $0x90] sm:$0xff] }
 0x128   :  { %v1025_v47 = vld [vmem:[#allocation4 + $0xb0] sm:$0xff] }
 0x129   :  { %v778_v54 = vpack.c.bf16 %v777_v53, %v777_v53  ;;  %v1788_v53 = vcombine.high %v1012_v50, %v1016_v51 }
 0x12b   :  { %1980 = vmatmul.mubr.bf16.vlgmr.msra.gmra.mxu0 %v778_v54  ;;  %v1787_v54 = vcombine.low %v1012_v50, %v1016_v51  ;;  %v1805_v50 = vcombine.low %v1029_v38, %v1033_v39 }
 0x12c   :  { %1429 = vmatpush1.bf16.msra.mxu0 %v1833_v59  ;;  %v1008_v59 = vld [vmem:[#allocation4 + $0x28] sm:$0xff] }
 0x12d   :  { %1430 = vmatprep.subr.bf16.mxu0 %v1826_v2  ;;  %v1779_v61 = vcombine.low %v1004_v57, %v1008_v59  ;;  %v1780_v62 = vcombine.high %v1004_v57, %v1008_v59  ;;  %v1018_v57 = vld [vmem:[#allocation4 + $0x78] sm:$0xff] }
 0x130   :  { %1431 = vmatpush1.bf16.msra.mxu0 %v1825_v3  ;;  %v1066_v3 = vld [vmem:[#allocation4 + $0x1f8] sm:$0xff] }
 0x131   :  { %1432 = vmatprep.subr.bf16.mxu0 %v1818_v6  ;;  %v1839_v5 = vcombine.low %v1062_v1, %v1066_v3  ;;  %v1840_v6 = vcombine.high %v1062_v1, %v1066_v3  ;;  %v1010_v1 = vld [vmem:[#allocation4 + $0x38] sm:$0xff]  ;;  %v1791_v3 = vcombine.low %v1014_v56, %v1018_v57 }
 0x134   :  { %1433 = vmatpush1.bf16.msra.mxu0 %v1817_v7  ;;  %v2184_v7 = vmov 0  }
 0x135   :  { %1434 = vmatprep.subr.bf16.mxu0 %v1810_v10  ;;  %1460 = vmatprep.mubr.bf16.mxu0 %v2184_v7 }
 0x138   :  { %1435 = vmatpush1.bf16.msra.mxu0 %v1809_v11  ;;  %v1053_v11 = vld [vmem:[#allocation4 + $0x190] sm:$0xff] }
 0x139   :  { %1436 = vmatprep.subr.bf16.mxu0 %v1802_v14  ;;  %v1054_v14 = vld [vmem:[#allocation4 + $0x198] sm:$0xff]  ;;  %v1829_v26 = vcombine.low %v1053_v11, %v1057_v13 }
 0x13c   :  { %1437 = vmatpush1.bf16.msra.mxu0 %v1801_v15  ;;  %v1058_v15 = vld [vmem:[#allocation4 + $0x1b8] sm:$0xff] }
 0x13d   :  { %1438 = vmatprep.subr.bf16.mxu0 %v1794_v18  ;;  %v1832_v20 = vcombine.high %v1054_v14, %v1058_v15  ;;  %v1831_v27 = vcombine.low %v1054_v14, %v1058_v15 }
 0x140   :  { %1439 = vmatpush1.bf16.msra.mxu0 %v1793_v19  ;;  %v1830_v19 = vcombine.high %v1053_v11, %v1057_v13 }
 0x141   :  { %1440 = vmatprep.subr.bf16.mxu0 %v1786_v22 }
 0x144   :  { %1441 = vmatpush1.bf16.msra.mxu0 %v1785_v23  ;;  %v1049_v23 = vld [vmem:[#allocation4 + $0x170] sm:$0xff] }
 0x145   :  { %1442 = vmatprep.subr.bf16.mxu0 %v1778_v58  ;;  %v1821_v34 = vcombine.low %v1045_v21, %v1049_v23  ;;  %v1797_v58 = vcombine.low %v1021_v46, %v1025_v47 }
 0x148   :  { %1443 = vmatpush1.bf16.msra.mxu0 %v1777_v60 }
 0x1eb   :  { %v883_v25 = vpop.f32.mrf.mxu0 }
 0x1ec   :  { %v884_v28 = vadd.f32 %v1759_v24, %v883_v25  ;;  %v1046_v24 = vld [vmem:[#allocation4 + $0x158] sm:$0xff] }
 0x1ed   :  { %v1981_v29 = vpop.f32.mrf.mxu0  ;;  %v1050_v25 = vld [vmem:[#allocation4 + $0x178] sm:$0xff] }
 0x1ee   :  { %v889_v30 = vpack.c.bf16 %v884_v28, %v884_v28  ;;  %v1822_v28 = vcombine.high %v1045_v21, %v1049_v23  ;;  %v1824_v29 = vcombine.high %v1046_v24, %v1050_v25 }
 0x1ef   :  { %v886_v32 = vpop.f32.mrf.mxu0 }
 0x1f0   :  { %890 = vst [vmem:[%s2349_s10] sm:$0xf] %v889_v30  ;;  %2000 = vmatmul.mubr.bf16.vlgmr.msra.gmra.mxu1 %v889_v30  ;;  %v1037_v30 = vld [vmem:[#allocation4 + $0x110] sm:$0xff]  ;;  %v1038_v32 = vld [vmem:[#allocation4 + $0x118] sm:$0xff] }
 0x1f1   :  { %v1982_v35 = vpop.f32.mrf.mxu0  ;;  %1470 = vmatpush1.bf16.msra.mxu1 %v1835_v0  ;;  %v1065_v0 = vld [vmem:[#allocation4 + $0x1f0] sm:$0xff]  ;;  %1501 = vmatprep.mubr.bf16.mxu1 %v2184_v7  ;;  %v1815_v43 = vcombine.low %v1038_v32, %v1042_v33 }
 0x1f2   :  { %1471 = vmatprep.subr.bf16.mxu1 %v1828_v31  ;;  %v1838_v2 = vcombine.high %v1061_v63, %v1065_v0  ;;  %v1837_v4 = vcombine.low %v1061_v63, %v1065_v0  ;;  %v1041_v31 = vld [vmem:[#allocation4 + $0x130] sm:$0xff]  ;;  %v1823_v35 = vcombine.low %v1046_v24, %v1050_v25  ;;  %v1006_v0 = vld [vmem:[#allocation4 + $0x18] sm:$0xff] }
 0x1f3   :  { %v1813_v42 = vcombine.low %v1037_v30, %v1041_v31  ;;  %v1009_v63 = vld [vmem:[#allocation4 + $0x30] sm:$0xff] }
 0x1f4   :  { %1510 = vmatprep.subr.bf16.mxu0 %v1838_v2 }
 0x1f5   :  { %1472 = vmatpush1.bf16.msra.mxu1 %v1827_v36  ;;  %v1814_v36 = vcombine.high %v1037_v30, %v1041_v31 }
 0x1f6   :  { %1473 = vmatprep.subr.bf16.mxu1 %v1820_v37  ;;  %v1816_v37 = vcombine.high %v1038_v32, %v1042_v33 }
 0x1f9   :  { %1474 = vmatpush1.bf16.msra.mxu1 %v1819_v40  ;;  %v1030_v40 = vld [vmem:[#allocation4 + $0xd8] sm:$0xff] }
 0x1fa   :  { %1475 = vmatprep.subr.bf16.mxu1 %v1812_v41  ;;  %v1034_v41 = vld [vmem:[#allocation4 + $0xf8] sm:$0xff] }
 0x1fb   :  { %v1807_v51 = vcombine.low %v1030_v40, %v1034_v41 }
 0x1fd   :  { %1476 = vmatpush1.bf16.msra.mxu1 %v1811_v44  ;;  %v1806_v44 = vcombine.high %v1029_v38, %v1033_v39 }
 0x1fe   :  { %1477 = vmatprep.subr.bf16.mxu1 %v1804_v45  ;;  %v1808_v45 = vcombine.high %v1030_v40, %v1034_v41 }
 0x201   :  { %1478 = vmatpush1.bf16.msra.mxu1 %v1803_v48  ;;  %v1022_v48 = vld [vmem:[#allocation4 + $0x98] sm:$0xff] }
 0x202   :  { %1479 = vmatprep.subr.bf16.mxu1 %v1796_v49  ;;  %v1026_v49 = vld [vmem:[#allocation4 + $0xb8] sm:$0xff] }
 0x203   :  { %v1799_v59 = vcombine.low %v1022_v48, %v1026_v49 }
 0x205   :  { %1480 = vmatpush1.bf16.msra.mxu1 %v1795_v52  ;;  %v1798_v52 = vcombine.high %v1021_v46, %v1025_v47 }
 0x206   :  { %1481 = vmatprep.subr.bf16.mxu1 %v1788_v53  ;;  %v1800_v53 = vcombine.high %v1022_v48, %v1026_v49 }
 0x209   :  { %1482 = vmatpush1.bf16.msra.mxu1 %v1787_v54  ;;  %v1013_v54 = vld [vmem:[#allocation4 + $0x50] sm:$0xff] }
 0x20a   :  { %1483 = vmatprep.subr.bf16.mxu1 %v1780_v62  ;;  %v1790_v60 = vcombine.high %v1013_v54, %v1017_v55  ;;  %v1005_v62 = vld [vmem:[#allocation4 + $0x10] sm:$0xff]  ;;  %v1789_v2 = vcombine.low %v1013_v54, %v1017_v55 }
 0x20d   :  { %1484 = vmatpush1.bf16.msra.mxu1 %v1779_v61  ;;  %v1792_v61 = vcombine.high %v1014_v56, %v1018_v57 }
 0x20e   :  { %1551 = vmatprep.subr.bf16.mxu1 %v1840_v6  ;;  %v1781_v6 = vcombine.low %v1005_v62, %v1009_v63 }
 0x2b0   :  { %v995_v9 = vpop.f32.mrf.mxu1 }
 0x2b1   :  { %v996_v10 = vadd.f32 %v1768_v8, %v995_v9  ;;  %v1068_v8 = vlaneseq }
 0x2b2   :  { %v2001_v12 = vpop.f32.mrf.mxu1 }
 0x2b3   :  { %v1001_v16 = vmax.f32 %v996_v10, 0.0  ;;  %v1069_v9 = vshrl.u32 %v1068_v8, 7  ;;  %v70_v12 = vld [vmem:[%s2347_s8] sm:$0xff] }
 0x2b4   :  { %v998_v17 = vpop.f32.mrf.mxu1 }
 0x2b5   :  { %v2318_v18 = vpack.c.bf16 %v1001_v16, %v1001_v16  ;;  %v1070_v10 = vsub.s32 0, %v1069_v9  ;;  %v1078_v11 = vsub.s32 2, %v1069_v9  ;;  %v1074_v13 = vsub.s32 1, %v1069_v9 }
 0x2b6   :  { %v2002_v22 = vpop.f32.mrf.mxu1  ;;  %v1082_v14 = vsub.s32 3, %v1069_v9  ;;  %v1098_v46 = vsub.s32 7, %v1069_v9 }
 0x2b7   :  { %1461 = vmatmul.mubr.bf16.vlgmr.msra.gmra.mxu0 %v2318_v18  ;;  %1502 = vmatmul.mubr.bf16.vlgmr.msra.gmra.mxu1 %v2318_v18  ;;  %v1071_v15 = vrot.slane %v70_v12, %v1070_v10  ;;  %v1079_v16 = vrot.slane %v70_v12, %v1078_v11  ;;  %v1075_v17 = vrot.slane %v70_v12, %v1074_v13 }
 0x2b8   :  { %1511 = vmatpush1.bf16.msra.mxu0 %v1837_v4  ;;  %1552 = vmatpush1.bf16.msra.mxu1 %v1839_v5  ;;  %v1782_v4 = vcombine.high %v1005_v62, %v1009_v63  ;;  %v1784_v5 = vcombine.high %v1006_v0, %v1010_v1 }
 0x2b9   :  { %1512 = vmatprep.subr.bf16.mxu0 %v1830_v19  ;;  %1553 = vmatprep.subr.bf16.mxu1 %v1832_v20  ;;  %v1083_v19 = vrot.slane %v70_v12, %v1082_v14 }
 0x2ba   :  { %1542 = vmatprep.mubr.bf16.mxu0 %v2184_v7  ;;  %1583 = vmatprep.mubr.bf16.mxu1 %v2184_v7  ;;  %v1783_v7 = vcombine.low %v1006_v0, %v1010_v1 }
 0x2bc   :  { %1513 = vmatpush1.bf16.msra.mxu0 %v1829_v26  ;;  %1554 = vmatpush1.bf16.msra.mxu1 %v1831_v27 }
 0x2bd   :  { %1514 = vmatprep.subr.bf16.mxu0 %v1822_v28  ;;  %1555 = vmatprep.subr.bf16.mxu1 %v1824_v29 }
 0x2c0   :  { %1515 = vmatpush1.bf16.msra.mxu0 %v1821_v34  ;;  %1556 = vmatpush1.bf16.msra.mxu1 %v1823_v35 }
 0x2c1   :  { %1516 = vmatprep.subr.bf16.mxu0 %v1814_v36  ;;  %1557 = vmatprep.subr.bf16.mxu1 %v1816_v37 }
 0x2c4   :  { %1517 = vmatpush1.bf16.msra.mxu0 %v1813_v42  ;;  %1558 = vmatpush1.bf16.msra.mxu1 %v1815_v43  ;;  %v1086_v43 = vsub.s32 4, %v1069_v9 }
 0x2c5   :  { %1518 = vmatprep.subr.bf16.mxu0 %v1806_v44  ;;  %1559 = vmatprep.subr.bf16.mxu1 %v1808_v45  ;;  %v1094_v44 = vsub.s32 6, %v1069_v9  ;;  %v1090_v45 = vsub.s32 5, %v1069_v9 }
 0x2c6   :  { %v1087_v47 = vrot.slane %v70_v12, %v1086_v43 }
 0x2c7   :  { %v1095_v48 = vrot.slane %v70_v12, %v1094_v44  ;;  %v1091_v49 = vrot.slane %v70_v12, %v1090_v45 }
 0x2c8   :  { %1519 = vmatpush1.bf16.msra.mxu0 %v1805_v50  ;;  %1560 = vmatpush1.bf16.msra.mxu1 %v1807_v51  ;;  %v1099_v50 = vrot.slane %v70_v12, %v1098_v46 }
 0x2c9   :  { %1520 = vmatprep.subr.bf16.mxu0 %v1798_v52  ;;  %1561 = vmatprep.subr.bf16.mxu1 %v1800_v53 }
 0x2cc   :  { %1521 = vmatpush1.bf16.msra.mxu0 %v1797_v58  ;;  %1562 = vmatpush1.bf16.msra.mxu1 %v1799_v59 }
 0x2cd   :  { %1522 = vmatprep.subr.bf16.mxu0 %v1790_v60  ;;  %1563 = vmatprep.subr.bf16.mxu1 %v1792_v61 }
 0x2d0   :  { %1523 = vmatpush1.bf16.msra.mxu0 %v1789_v2  ;;  %1564 = vmatpush1.bf16.msra.mxu1 %v1791_v3 }
 0x2d1   :  { %1524 = vmatprep.subr.bf16.mxu0 %v1782_v4  ;;  %1565 = vmatprep.subr.bf16.mxu1 %v1784_v5 }
 0x2d4   :  { %1525 = vmatpush1.bf16.msra.mxu0 %v1781_v6  ;;  %1566 = vmatpush1.bf16.msra.mxu1 %v1783_v7 }
 0x2d7   :  { %1543 = vmatmul.mubr.bf16.vlgmr.msra.gmra.mxu0 %v2318_v18  ;;  %1584 = vmatmul.mubr.bf16.vlgmr.msra.gmra.mxu1 %v2318_v18 }
 0x377   :  { %v1462_v20 = vpop.f32.mrf.mxu0  ;;  %v1503_v21 = vpop.f32.mrf.mxu1 }
 0x378   :  { %v1463_v22 = vadd.f32 %v1462_v20, %v1071_v15  ;;  %v1504_v23 = vadd.f32 %v1503_v21, %v1079_v16 }
 0x379   :  { %v1464_v24 = vpop.f32.mrf.mxu0  ;;  %v1505_v18 = vpop.f32.mrf.mxu1 }
 0x37a   :  { %v1841_v25 = vmul.f32 -1.442695, %v1463_v22  ;;  %v1843_v26 = vmul.f32 -1.442695, %v1504_v23  ;;  %v1465_v27 = vadd.f32 %v1464_v24, %v1075_v17  ;;  %v1506_v28 = vadd.f32 %v1505_v18, %v1083_v19 }
 0x37b   :  { %v1466_v29 = vpop.f32.mrf.mxu0  ;;  %v1507_v30 = vpop.f32.mrf.mxu1 }
 0x37c   :  { %2100 = vpow2.f32 %v1841_v25  ;;  %v1842_v31 = vmul.f32 -1.442695, %v1465_v27  ;;  %v1844_v32 = vmul.f32 -1.442695, %v1506_v28 }
 0x37d   :  { %2102 = vpow2.f32 %v1843_v26  ;;  %v1467_v33 = vpop.f32.mrf.mxu0  ;;  %v1508_v34 = vpop.f32.mrf.mxu1 }
 0x37e   :  { %2104 = vpow2.f32 %v1842_v31 }
 0x37f   :  { %2106 = vpow2.f32 %v1844_v32 }
 0x389   :  { %v2101_v35 = vpop.eup %2100 }
 0x38a   :  { %v2103_v36 = vpop.eup %2102  ;;  %v1616_v37 = vadd.f32 1.0, %v2101_v35 }
 0x38b   :  { %v2105_v38 = vpop.eup %2104  ;;  %v1618_v39 = vadd.f32 1.0, %v2103_v36 }
 0x38c   :  { %v2107_v40 = vpop.eup %2106  ;;  %2108 = vrcp.f32 %v1616_v37  ;;  %v1617_v41 = vadd.f32 1.0, %v2105_v38 }
 0x38d   :  { %2110 = vrcp.f32 %v1618_v39  ;;  %v1619_v42 = vadd.f32 1.0, %v2107_v40 }
 0x38e   :  { %2112 = vrcp.f32 %v1617_v41 }
 0x38f   :  { %2114 = vrcp.f32 %v1619_v42 }
 0x397   :  { %v1544_v51 = vpop.f32.mrf.mxu0  ;;  %v1585_v52 = vpop.f32.mrf.mxu1 }
 0x398   :  { %v1545_v53 = vadd.f32 %v1544_v51, %v1087_v47  ;;  %v1586_v54 = vadd.f32 %v1585_v52, %v1095_v48 }
 0x399   :  { %v2109_v55 = vpop.eup %2108  ;;  %v1546_v56 = vpop.f32.mrf.mxu0 }
 0x39a   :  { %v1587_v57 = vpop.f32.mrf.mxu1  ;;  %v2111_v58 = vpop.eup %2110  ;;  %v1845_v59 = vmul.f32 -1.442695, %v1545_v53  ;;  %v1847_v60 = vmul.f32 -1.442695, %v1586_v54  ;;  %v1547_v61 = vadd.f32 %v1546_v56, %v1091_v49 }
 0x39b   :  { %v1588_v62 = vadd.f32 %v1587_v57, %v1099_v50  ;;  %v2113_v63 = vpop.eup %2112  ;;  %v1548_v0 = vpop.f32.mrf.mxu0 }
 0x39c   :  { %v1589_v1 = vpop.f32.mrf.mxu1  ;;  %v2115_v2 = vpop.eup %2114  ;;  %v1853_v3 = vpack.c.bf16 %v2113_v63, %v2109_v55  ;;  %2116 = vpow2.f32 %v1845_v59  ;;  %v1846_v4 = vmul.f32 -1.442695, %v1547_v61 }
 0x39d   :  { %v1848_v5 = vmul.f32 -1.442695, %v1588_v62  ;;  %v1854_v6 = vpack.c.bf16 %v2115_v2, %v2111_v58  ;;  %2118 = vpow2.f32 %v1847_v60  ;;  %v1549_v7 = vpop.f32.mrf.mxu0 }
 0x39e   :  { %v1590_v8 = vpop.f32.mrf.mxu1  ;;  %1672 = vst [vmem:[%s2348_s9] sm:$0xff] %v1853_v3  ;;  %2120 = vpow2.f32 %v1846_v4 }
 0x39f   :  { %1673 = vst [vmem:[%s2348_s9 + $0x8] sm:$0xff] %v1854_v6  ;;  %2122 = vpow2.f32 %v1848_v5 }
 0x3a9   :  { %v2117_v9 = vpop.eup %2116 }
 0x3aa   :  { %v2119_v10 = vpop.eup %2118  ;;  %v1620_v11 = vadd.f32 1.0, %v2117_v9 }
 0x3ab   :  { %v2121_v12 = vpop.eup %2120  ;;  %v1622_v13 = vadd.f32 1.0, %v2119_v10 }
 0x3ac   :  { %v2123_v14 = vpop.eup %2122  ;;  %2124 = vrcp.f32 %v1620_v11  ;;  %v1621_v15 = vadd.f32 1.0, %v2121_v12 }
 0x3ad   :  { %2126 = vrcp.f32 %v1622_v13  ;;  %v1623_v16 = vadd.f32 1.0, %v2123_v14 }
 0x3ae   :  { %2128 = vrcp.f32 %v1621_v15 }
 0x3af   :  { %2130 = vrcp.f32 %v1623_v16 }
 0x3b9   :  { %v2125_v17 = vpop.eup %2124 }
 0x3ba   :  { %v2127_v19 = vpop.eup %2126 }
 0x3bb   :  { %v2129_v20 = vpop.eup %2128 }
 0x3bc   :  { %v2131_v21 = vpop.eup %2130  ;;  %v1855_v22 = vpack.c.bf16 %v2129_v20, %v2125_v17 }
 0x3bd   :  { %v1856_v23 = vpack.c.bf16 %v2131_v21, %v2127_v19 }
 0x3be   :  { %1674 = vst [vmem:[%s2348_s9 + $0x10] sm:$0xff] %v1855_v22 }
 0x3bf   :  { %1675 = vst [vmem:[%s2348_s9 + $0x18] sm:$0xff] %v1856_v23 }
 0x3c0   :  { %1684 = vsyncpa [#allocation3], 1 }
 0x3c1   :  { %1685 = vsyncpa [#allocation5], 1 }

</bundles_post_ra>
